<compile_context>
chip_gen: v6e
topology: v6e:2x2x1
jax: 0.10.0
libtpu: 0.0.40
codegen_flags: <defaults>
</compile_context>

<pallas_src>
import functools

import jax
import jax.numpy as jnp
from jax.experimental import pallas as pl
from jax.experimental.pallas import tpu as pltpu

_VMEM_BUDGET = 26 * 2**20   # working-set target: safe on v7x (64 MiB phys / 32 scoped)
_VMEM_LIMIT = 32 * 2**20    # raise v5e's 16 MiB default scoped VMEM limit


def _round_up(x, m):
    return ((x + m - 1) // m) * m


def _fused_head_kernel(x_ref, w5_ref, b5_ref, w6_ref, b6_ref, o_ref, *, out_relu):
    """One row tile, weights resident: relu(x@w5+b5) @ w6 + b6 (+ relu)."""
    # fc5 on the MXU, f32 accumulation.
    h = jnp.dot(x_ref[...], w5_ref[...], preferred_element_type=jnp.float32)
    # Bias + ReLU epilogue in f32 (friendly to v5e's f32-only VPU).
    h = jnp.maximum(h + b5_ref[...], 0.0)
    # fc6 on the MXU (in compute dtype when bf16 was requested), f32 accumulation.
    y = jnp.dot(h.astype(w6_ref.dtype), w6_ref[...],
                preferred_element_type=jnp.float32)
    y = y + b6_ref[...]
    if out_relu:
        y = jnp.maximum(y, 0.0)
    o_ref[...] = y.astype(o_ref.dtype)


def _ktiled_head_kernel(x_ref, w5_ref, b5_ref, w6_ref, b6_ref, o_ref, acc_ref, *,
                        out_relu):
    """Fallback for very large in_channels: fc5 reduced over the K grid axis."""
    k = pl.program_id(1)

    @pl.when(k == 0)
    def _():
        acc_ref[...] = jnp.zeros_like(acc_ref)

    acc_ref[...] += jnp.dot(x_ref[...], w5_ref[...],
                            preferred_element_type=jnp.float32)

    @pl.when(k == pl.num_programs(1) - 1)
    def _():
        h = jnp.maximum(acc_ref[...] + b5_ref[...], 0.0)
        y = jnp.dot(h.astype(w6_ref.dtype), w6_ref[...],
                    preferred_element_type=jnp.float32)
        y = y + b6_ref[...]
        if out_relu:
            y = jnp.maximum(y, 0.0)
        o_ref[...] = y.astype(o_ref.dtype)


def _pick_tm(B, block_m, row_align):
    """Row-tile size: sublane-aligned, and >= 2 tiles when B allows so the
    'parallel' grid axis feeds both v7x TensorCores."""
    if B <= row_align:
        return B                                    # one tile == full batch dim
    half = _round_up(-(-B // 2), row_align)         # ceil(B/2), sublane-aligned
    return max(row_align, min(block_m, half))


def mlp_head(x, w5, b5, w6, b6, *, out_relu=True, block_m=512, block_k=2048,
             compute_dtype=None):
    """MLPHead forward: relu(x @ w5 + b5) @ w6 + b6 (+ relu).

    x : (B, in_channels)   already flattened (torch's flatten(start_dim=1))
    w5: (in_channels, R)   fc5 weight pre-transposed to (in, out)
    b5: (R,)
    w6: (R, R)             fc6 weight pre-transposed
    b6: (R,)
    compute_dtype: jnp.bfloat16 is recommended on ALL TPU generations
        (v5e/v6e/v7x MXUs are bf16-native; halves HBM traffic on the dominant
        x / w5 streams).  Accumulation is always f32 and the bias/ReLU
        epilogue stays f32.  Note: with bf16, BOTH matmuls run in bf16 — an
        explicit opt-in precision trade-off vs. the f32 PyTorch reference.
    """
    B, Cin = x.shape
    R = w5.shape[1]
    out_dtype = x.dtype

    if compute_dtype is not None:
        x = x.astype(compute_dtype)
        w5 = w5.astype(compute_dtype)
        w6 = w6.astype(compute_dtype)

    # Biases kept f32; added post-accumulation in the epilogue.
    b5_2d = b5.reshape(1, R).astype(jnp.float32)
    b6_2d = b6.reshape(1, R).astype(jnp.float32)

    itemsize = jnp.dtype(x.dtype).itemsize
    out_itemsize = jnp.dtype(out_dtype).itemsize
    row_align = 16 if x.dtype == jnp.bfloat16 else 8

    # Advisory cost for XLA scheduling around this custom call.
    cost = pl.CostEstimate(
        flops=2 * B * Cin * R + 2 * B * R * R,
        transcendentals=0,
        bytes_accessed=(x.size * itemsize + w5.size * itemsize
                        + w6.size * itemsize + (b5_2d.size + b6_2d.size) * 4
                        + B * R * out_itemsize),
    )

    def resident_vmem(tm_):
        # Conservative: assume the pipeline double-buffers every input block.
        return (2 * tm_ * Cin * itemsize          # x row tile
                + 2 * Cin * R * itemsize          # resident fc5 weight
                + 2 * R * R * itemsize            # resident fc6 weight
                + 4 * R * 4                       # biases (f32)
                + 2 * tm_ * R * out_itemsize      # output tile
                + 2 * tm_ * R * 4)                # f32 intermediates (h, y)

    tm = _pick_tm(B, block_m, row_align)
    while tm > row_align and resident_vmem(tm) > _VMEM_BUDGET:
        tm = max(row_align, _round_up(tm // 2, row_align))

    if resident_vmem(tm) <= _VMEM_BUDGET:
        # ---------------- fast path: w5 fully resident, single pass ----------
        grid = (pl.cdiv(B, tm),)
        kernel = functools.partial(_fused_head_kernel, out_relu=out_relu)
        return pl.pallas_call(
            kernel,
            out_shape=jax.ShapeDtypeStruct((B, R), out_dtype),
            grid_spec=pltpu.PrefetchScalarGridSpec(
                num_scalar_prefetch=0,
                grid=grid,
                in_specs=[
                    pl.BlockSpec((tm, Cin), lambda i: (i, 0)),   # x row tile
                    pl.BlockSpec((Cin, R), lambda i: (0, 0)),    # w5 (resident)
                    pl.BlockSpec((1, R), lambda i: (0, 0)),      # b5 (resident)
                    pl.BlockSpec((R, R), lambda i: (0, 0)),      # w6 (resident)
                    pl.BlockSpec((1, R), lambda i: (0, 0)),      # b6 (resident)
                ],
                out_specs=pl.BlockSpec((tm, R), lambda i: (i, 0)),
            ),
            compiler_params=pltpu.CompilerParams(
                dimension_semantics=("parallel",),
                vmem_limit_bytes=_VMEM_LIMIT),
            cost_estimate=cost,
        )(x, w5, b5_2d, w6, b6_2d)

    # ------------- fallback: in_channels too large for a resident w5 ---------
    # K-tiled f32 accumulation.  Rare path; the jnp.pad copy of x/w5 (only when
    # Cin isn't 128-aligned) is a documented extra HBM round-trip.
    Kp = _round_up(Cin, 128)
    tk = min(_round_up(block_k, 128), Kp)
    while Kp % tk:                     # keep reduction blocks full (no ragged K)
        tk -= 128

    def tiled_vmem(tm_, tk_):
        return (2 * tm_ * tk_ * itemsize + 2 * tk_ * R * itemsize
                + 2 * R * R * itemsize + 4 * R * 4
                + 2 * tm_ * R * out_itemsize + 3 * tm_ * R * 4)

    while tm > row_align and tiled_vmem(tm, tk) > _VMEM_BUDGET:
        tm = max(row_align, _round_up(tm // 2, row_align))
    if tiled_vmem(tm, tk) > _VMEM_BUDGET:
        tk = 128                       # always divides Kp

    if Kp != Cin:
        x = jnp.pad(x, ((0, 0), (0, Kp - Cin)))
        w5 = jnp.pad(w5, ((0, Kp - Cin), (0, 0)))

    grid = (pl.cdiv(B, tm), Kp // tk)
    kernel = functools.partial(_ktiled_head_kernel, out_relu=out_relu)
    return pl.pallas_call(
        kernel,
        out_shape=jax.ShapeDtypeStruct((B, R), out_dtype),
        grid_spec=pltpu.PrefetchScalarGridSpec(
            num_scalar_prefetch=0,
            grid=grid,
            in_specs=[
                pl.BlockSpec((tm, tk), lambda i, k: (i, k)),   # x
                pl.BlockSpec((tk, R), lambda i, k: (k, 0)),    # w5 K-slice
                pl.BlockSpec((1, R), lambda i, k: (0, 0)),     # b5
                pl.BlockSpec((R, R), lambda i, k: (0, 0)),     # w6
                pl.BlockSpec((1, R), lambda i, k: (0, 0)),     # b6
            ],
            out_specs=pl.BlockSpec((tm, R), lambda i, k: (i, 0)),
            scratch_shapes=[pltpu.VMEM((tm, R), jnp.float32)],
        ),
        compiler_params=pltpu.CompilerParams(
            dimension_semantics=("parallel", "arbitrary"),
            vmem_limit_bytes=_VMEM_LIMIT),
        cost_estimate=cost,
    )(x, w5, b5_2d, w6, b6_2d)


if __name__ == "__main__":
    key = jax.random.PRNGKey(0)

    # Shapes consistent with the module's ROI-head usage: pooled ROI features
    # (N, C, H, W) = (2, 4, 16, 16) -> flatten to (2, 1024); representation=128.
    B, C, H, W = 2, 4, 16, 16
    in_channels = C * H * W              # 1024
    representation_size = 128

    k_x, k_w5, k_b5, k_w6, k_b6, k_x2 = jax.random.split(key, 6)
    x_nchw = jax.random.normal(k_x, (B, C, H, W), dtype=jnp.float32)

    # Deterministic synthetic params, stored in PyTorch convention (out, in).
    w5_oi = jax.random.normal(k_w5, (representation_size, in_channels),
                              dtype=jnp.float32) * 0.02
    b5 = jax.random.normal(k_b5, (representation_size,), dtype=jnp.float32) * 0.02
    w6_oi = jax.random.normal(k_w6, (representation_size, representation_size),
                              dtype=jnp.float32) * 0.02
    b6 = jax.random.normal(k_b6, (representation_size,), dtype=jnp.float32) * 0.02

    def torch_ref(xf, relu_out=True):
        y = jnp.maximum(xf @ w5_oi.T + b5, 0.0)
        y = y @ w6_oi.T + b6
        return jnp.maximum(y, 0.0) if relu_out else y

    # Wrapper glue: flatten(start_dim=1) + (out,in)->(in,out) weight transpose.
    x_flat = x_nchw.reshape(B, -1)

    # 1) f32 path, single row tile (block == full batch dim, no padding).
    out = jax.block_until_ready(
        mlp_head(x_flat, w5_oi.T, b5, w6_oi.T, b6, out_relu=True))
    assert out.shape == (B, representation_size)
    assert jnp.allclose(out, torch_ref(x_flat), atol=1e-4, rtol=1e-4)

    # 2) bf16 MXU path (recommended on v5e/v6e/v7x); f32 accumulation.
    out_bf16 = jax.block_until_ready(
        mlp_head(x_flat, w5_oi.T, b5, w6_oi.T, b6, out_relu=True,
                 compute_dtype=jnp.bfloat16))
    assert out_bf16.shape == (B, representation_size)
    assert jnp.allclose(out_bf16, torch_ref(x_flat), atol=5e-2, rtol=5e-2)

    # 3) Many-ROI batch (2 images x 29 boxes = 58 rows): exercises the
    #    multi-row-tile "parallel" grid with a ragged last tile (no jnp.pad).
    B2 = 58
    x2 = jax.random.normal(k_x2, (B2, in_channels), dtype=jnp.float32)
    out2 = jax.block_until_ready(
        mlp_head(x2, w5_oi.T, b5, w6_oi.T, b6, out_relu=False))
    assert out2.shape == (B2, representation_size)
    assert jnp.allclose(out2, torch_ref(x2, relu_out=False), atol=1e-3, rtol=1e-3)

    # TODO(synk): the rest of CrossAlignModel (ResNet encoder, ROI align,
    # attention pooler, GPT language model, Cox loss) is out of scope for a
    # single Pallas kernel; only the MLPHead building block is implemented.

    print("KERNEL_OK")
</pallas_src>

<mosaic_0001>
module attributes {stable_mosaic.version = 11 : i64} {
  func.func @_fused_head_kernel(%arg0: i32, %arg1: memref<2x1024xf32, #tpu.memory_space<vmem>>, %arg2: memref<1024x128xf32, #tpu.memory_space<vmem>>, %arg3: memref<1x128xf32, #tpu.memory_space<vmem>>, %arg4: memref<128x128xf32, #tpu.memory_space<vmem>>, %arg5: memref<1x128xf32, #tpu.memory_space<vmem>>, %arg6: memref<2x128xf32, #tpu.memory_space<vmem>>) attributes {dimension_semantics = [#tpu.dimension_semantics<parallel>], iteration_bounds = array<i64: 1>, scalar_prefetch = 0 : i64, scratch_operands = 0 : i64, tpu.core_type = #tpu.core_type<tc>, window_params = [{transform_indices = @transform_0, window_bounds = array<i64: 2, 1024>}, {pipeline_mode = #tpu.pipeline_mode<synchronous>, transform_indices = @transform_1, window_bounds = array<i64: 1024, 128>}, {pipeline_mode = #tpu.pipeline_mode<synchronous>, transform_indices = @transform_2, window_bounds = array<i64: 1, 128>}, {pipeline_mode = #tpu.pipeline_mode<synchronous>, transform_indices = @transform_3, window_bounds = array<i64: 128, 128>}, {pipeline_mode = #tpu.pipeline_mode<synchronous>, transform_indices = @transform_4, window_bounds = array<i64: 1, 128>}, {transform_indices = @transform_5, window_bounds = array<i64: 2, 128>}]} {
    %c0 = arith.constant 0 : index
    %c0_0 = arith.constant 0 : index
    %0 = vector.load %arg1[%c0, %c0_0] : memref<2x1024xf32, #tpu.memory_space<vmem>>, vector<2x1024xf32>
    %c0_1 = arith.constant 0 : index
    %c0_2 = arith.constant 0 : index
    %1 = vector.load %arg2[%c0_1, %c0_2] : memref<1024x128xf32, #tpu.memory_space<vmem>>, vector<1024x128xf32>
    %cst = arith.constant dense<0.000000e+00> : vector<2x128xf32>
    %2 = tpu.matmul %0, %1, %cst {dimension_numbers = #tpu.dot_dimension_numbers<[1], [0], [0], [1], [0, 0, 1, 1], [], []>} : vector<2x1024xf32>, vector<1024x128xf32>, vector<2x128xf32> -> vector<2x128xf32>
    %c0_3 = arith.constant 0 : index
    %c0_4 = arith.constant 0 : index
    %3 = vector.load %arg3[%c0_3, %c0_4] : memref<1x128xf32, #tpu.memory_space<vmem>>, vector<1x128xf32>
    %4 = vector.broadcast %3 : vector<1x128xf32> to vector<2x128xf32>
    %5 = arith.addf %2, %4 : vector<2x128xf32>
    %cst_5 = arith.constant 0.000000e+00 : f32
    %6 = vector.broadcast %cst_5 : f32 to vector<2x128xf32>
    %7 = arith.maximumf %5, %6 : vector<2x128xf32>
    %c0_6 = arith.constant 0 : index
    %c0_7 = arith.constant 0 : index
    %8 = vector.load %arg4[%c0_6, %c0_7] : memref<128x128xf32, #tpu.memory_space<vmem>>, vector<128x128xf32>
    %cst_8 = arith.constant dense<0.000000e+00> : vector<2x128xf32>
    %9 = tpu.matmul %7, %8, %cst_8 {dimension_numbers = #tpu.dot_dimension_numbers<[1], [0], [0], [1], [0, 0, 1, 1], [], []>} : vector<2x128xf32>, vector<128x128xf32>, vector<2x128xf32> -> vector<2x128xf32>
    %c0_9 = arith.constant 0 : index
    %c0_10 = arith.constant 0 : index
    %10 = vector.load %arg5[%c0_9, %c0_10] : memref<1x128xf32, #tpu.memory_space<vmem>>, vector<1x128xf32>
    %11 = vector.broadcast %10 : vector<1x128xf32> to vector<2x128xf32>
    %12 = arith.addf %9, %11 : vector<2x128xf32>
    %cst_11 = arith.constant 0.000000e+00 : f32
    %13 = vector.broadcast %cst_11 : f32 to vector<2x128xf32>
    %14 = arith.maximumf %12, %13 : vector<2x128xf32>
    %c0_12 = arith.constant 0 : index
    %c0_13 = arith.constant 0 : index
    %15 = vector.load %arg6[%c0_12, %c0_13] : memref<2x128xf32, #tpu.memory_space<vmem>>, vector<2x128xf32>
    tpu.vector_store %arg6[%c0_12, %c0_13], %14 {strides = array<i32>} : memref<2x128xf32, #tpu.memory_space<vmem>>, vector<2x128xf32>,
    return
  }
  func.func @transform_0(%arg0: i32) -> (i32, i32) {
    %c0_i32 = arith.constant 0 : i32
    %c0_i32_0 = arith.constant 0 : i32
    return %arg0, %c0_i32 : i32, i32
  }
  func.func @transform_1(%arg0: i32) -> (i32, i32) {
    %c0_i32 = arith.constant 0 : i32
    %c0_i32_0 = arith.constant 0 : i32
    %c0_i32_1 = arith.constant 0 : i32
    return %c0_i32, %c0_i32_0 : i32, i32
  }
  func.func @transform_2(%arg0: i32) -> (i32, i32) {
    %c0_i32 = arith.constant 0 : i32
    %c0_i32_0 = arith.constant 0 : i32
    %c0_i32_1 = arith.constant 0 : i32
    return %c0_i32, %c0_i32_0 : i32, i32
  }
  func.func @transform_3(%arg0: i32) -> (i32, i32) {
    %c0_i32 = arith.constant 0 : i32
    %c0_i32_0 = arith.constant 0 : i32
    %c0_i32_1 = arith.constant 0 : i32
    return %c0_i32, %c0_i32_0 : i32, i32
  }
  func.func @transform_4(%arg0: i32) -> (i32, i32) {
    %c0_i32 = arith.constant 0 : i32
    %c0_i32_0 = arith.constant 0 : i32
    %c0_i32_1 = arith.constant 0 : i32
    return %c0_i32, %c0_i32_0 : i32, i32
  }
  func.func @transform_5(%arg0: i32) -> (i32, i32) {
    %c0_i32 = arith.constant 0 : i32
    %c0_i32_0 = arith.constant 0 : i32
    return %arg0, %c0_i32 : i32, i32
  }
}

</mosaic_0001>

<bundles_post_ra>
// kernel: tpu_custom_call.1
= control target key start
LH: loop header
LB: loop body
LE: loop exit
PB: predicated region body
PF: predicated region fallthrough
CT: control target
= control target key end

     0   :  { %10 = vsyncpa [#allocation3], 0  ;;  %s987_s0 = inlined_call_operand.hbm [shape: f32[2,1024], index: 0, kind: input, shape index: {}]   ;;  %s988_s1 = inlined_call_operand.hbm [shape: f32[1024,128], index: 1, kind: input, shape index: {}]   ;;  %s989_s2 = inlined_call_operand.vmem [shape: f32[1,128], index: 2, kind: input, shape index: {}]   ;;  %s990_s3 = inlined_call_operand.hbm [shape: f32[128,128], index: 3, kind: input, shape index: {}]   ;;  %s991_s4 = inlined_call_operand.vmem [shape: f32[1,128], index: 4, kind: input, shape index: {}]   ;;  %s992_s5 = inlined_call_operand.hbm [shape: f32[2,128], index: 5, kind: output, shape index: {}]  }
   0x1   :  { %11 = vsyncpa [#allocation6], 0 }
   0x2   :  { %12 = vsyncpa [#allocation4], 0  ;;  %s924_s18 = smov [#allocation5]  }
   0x3   :  { %s28_s19 = sshll.u32 %s924_s18, 4  ;;  %s29_s19 = int_to_ptr.vmem [resolvable:$true] %s28_s19 }
   0x4   :  { %s846_s20 = scalar_lea.vmem %s29_s19, 16384  ;;  %p851_p1 = scmp.lt.s32.totalorder %s29_s19, %s29_s19 }
   0x5   :  { %p847_p0 = scmp.ne.s32.totalorder %s29_s19, %s846_s20  ;;  %p852_p2 = scmp.lt.s32.totalorder %s846_s20, %s846_s20 }
   0x7   :  { %p853_p3 = por %p852_p2, %p851_p1 }
   0x9   :  { %p854_p4 = pnand %p853_p3, %p847_p0 }
   0xb   :  { %857 = shalt.err (!%p854_p4)
}
   0xc   :  { %s925_s21 = smov 128   ;;  %s926_s22 = smov 8  }
   0xd   :  { %34 = dma.hbm_to_vmem [thread:$0]  %s988_s1, 16384, %s29_s19, [#allocation6], %s925_s21, %s925_s21, %s926_s22  }
   0xe   :  { %s927_s25 = smov [#allocation2]   ;;  %s928_s27 = smov [#allocation7]  }
   0xf   :  { %s19_s26 = sshll.u32 %s927_s25, 4  ;;  %s42_s28 = sshll.u32 %s928_s27, 4  ;;  %s20_s26 = int_to_ptr.vmem [resolvable:$true] %s19_s26  ;;  %s43_s28 = int_to_ptr.vmem [resolvable:$true] %s42_s28 }
  0x10   :  { %s866_s29 = scalar_lea.vmem %s20_s26, 256  ;;  %p871_p6 = scmp.lt.s32.totalorder %s20_s26, %s20_s26 }
  0x11   :  { %p867_p5 = scmp.ne.s32.totalorder %s20_s26, %s866_s29  ;;  %p872_p7 = scmp.lt.s32.totalorder %s866_s29, %s866_s29 }
  0x13   :  { %p873_p8 = por %p872_p7, %p871_p6 }
  0x15   :  { %p874_p9 = pnand %p873_p8, %p867_p5 }
  0x17   :  { %877 = shalt.err (!%p874_p9)
}
  0x18   :  { %22 = dma.hbm_to_vmem [thread:$0]  %s987_s0, 256, %s20_s26, [#allocation3]  }
  0x19   :  { %s886_s7 = scalar_lea.vmem %s43_s28, 2048  ;;  %p891_p11 = scmp.lt.s32.totalorder %s43_s28, %s43_s28 }
  0x1a   :  { %p887_p10 = scmp.ne.s32.totalorder %s43_s28, %s886_s7  ;;  %p892_p12 = scmp.lt.s32.totalorder %s886_s7, %s886_s7 }
  0x1c   :  { %p893_p13 = por %p892_p12, %p891_p11 }
  0x1e   :  { %p894_p0 = pnand %p893_p13, %p887_p10 }
  0x20   :  { %897 = shalt.err (!%p894_p0)
}
  0x21   :  { %48 = dma.hbm_to_vmem [thread:$0]  %s990_s3, 2048, %s43_s28, [#allocation6], %s925_s21, %s925_s21, %s926_s22  }
  0x22   :  { %918 = dma.done.wait [#allocation3], 256  }
  0x23   :  { %919 = vsyncadd [#allocation3], 4294967040 }
  0x24   :  { %920 = dma.done.wait [#allocation6], 18432  }
  0x25   :  { %921 = vsyncadd [#allocation6], 4294948864  ;;  %v93_v0 = vld [vmem:[#allocation5 + $0xf8] sm:$0xff]  ;;  %v92_v4 = vld [vmem:[#allocation5 + $0xf0] sm:$0xff]  ;;  %v929_v30 = vmov 1983009808   ;;  %v203_v32 = vlaneseq }
  0x26   :  { %v125_v1 = vld [vmem:[#allocation5 + $0x1f8] sm:$0xff]  ;;  %635 = vmatprep.subr.mxu0 %v93_v0  ;;  %v124_v5 = vld [vmem:[#allocation5 + $0x1f0] sm:$0xff]  ;;  %v91_v8 = vld [vmem:[#allocation5 + $0xe8] sm:$0xff]  ;;  %v201_v31 = vunpack.c.l.s4 %v929_v30  ;;  %vm931_vm0 = vmmov 0  }
  0x27   :  { %v77_v2 = vld [vmem:[#allocation5 + $0x78] sm:$0xff]  ;;  %670 = vmatprep.subr.mxu1 %v125_v1  ;;  %v76_v6 = vld [vmem:[#allocation5 + $0x70] sm:$0xff]  ;;  %v123_v9 = vld [vmem:[#allocation5 + $0x1e8] sm:$0xff]  ;;  %v204_v42 = vshrl.u32 %v203_v32, 7 }
  0x28   :  { %v109_v3 = vld [vmem:[#allocation5 + $0x178] sm:$0xff]  ;;  %636 = vmatpush3.msra.mxu0 %v77_v2  ;;  %v108_v7 = vld [vmem:[#allocation5 + $0x170] sm:$0xff]  ;;  %v75_v10 = vld [vmem:[#allocation5 + $0x68] sm:$0xff]  ;;  %v202_v41 = vunpack.c.0.s8 %v201_v31 }
  0x29   :  { %671 = vmatpush3.msra.mxu1 %v109_v3  ;;  %637 = vmatprep.subr.mxu0 %v92_v4  ;;  %v107_v11 = vld [vmem:[#allocation5 + $0x168] sm:$0xff]  ;;  %v90_v12 = vld [vmem:[#allocation5 + $0xe0] sm:$0xff]  ;;  %v89_v16 = vld [vmem:[#allocation5 + $0xd8] sm:$0xff] }
  0x2a   :  { %672 = vmatprep.subr.mxu1 %v124_v5  ;;  %638 = vmatpush3.msra.mxu0 %v76_v6  ;;  %v122_v13 = vld [vmem:[#allocation5 + $0x1e0] sm:$0xff]  ;;  %v121_v17 = vld [vmem:[#allocation5 + $0x1d8] sm:$0xff]  ;;  %v88_v20 = vld [vmem:[#allocation5 + $0xd0] sm:$0xff]  ;;  %v972_v51 = vsub.s32 %v202_v41, %v204_v42 }
  0x2b   :  { %673 = vmatpush3.msra.mxu1 %v108_v7  ;;  %639 = vmatprep.subr.mxu0 %v91_v8  ;;  %v74_v14 = vld [vmem:[#allocation5 + $0x60] sm:$0xff]  ;;  %v73_v18 = vld [vmem:[#allocation5 + $0x58] sm:$0xff]  ;;  %v120_v21 = vld [vmem:[#allocation5 + $0x1d0] sm:$0xff] }
  0x2c   :  { %674 = vmatprep.subr.mxu1 %v123_v9  ;;  %v106_v15 = vld [vmem:[#allocation5 + $0x160] sm:$0xff]  ;;  %640 = vmatpush3.msra.mxu0 %v75_v10  ;;  %v105_v19 = vld [vmem:[#allocation5 + $0x158] sm:$0xff]  ;;  %v72_v22 = vld [vmem:[#allocation5 + $0x50] sm:$0xff] }
  0x2d   :  { %675 = vmatpush3.msra.mxu1 %v107_v11  ;;  %641 = vmatprep.subr.mxu0 %v90_v12  ;;  %v104_v23 = vld [vmem:[#allocation5 + $0x150] sm:$0xff]  ;;  %v87_v24 = vld [vmem:[#allocation5 + $0xc8] sm:$0xff]  ;;  %v86_v28 = vld [vmem:[#allocation5 + $0xc0] sm:$0xff] }
  0x2e   :  { %676 = vmatprep.subr.mxu1 %v122_v13  ;;  %642 = vmatpush3.msra.mxu0 %v74_v14  ;;  %v119_v25 = vld [vmem:[#allocation5 + $0x1c8] sm:$0xff]  ;;  %v118_v29 = vld [vmem:[#allocation5 + $0x1c0] sm:$0xff]  ;;  %v85_v35 = vld [vmem:[#allocation5 + $0xb8] sm:$0xff] }
  0x2f   :  { %677 = vmatpush3.msra.mxu1 %v106_v15  ;;  %643 = vmatprep.subr.mxu0 %v89_v16  ;;  %v71_v26 = vld [vmem:[#allocation5 + $0x48] sm:$0xff]  ;;  %v70_v33 = vld [vmem:[#allocation5 + $0x40] sm:$0xff]  ;;  %v117_v36 = vld [vmem:[#allocation5 + $0x1b8] sm:$0xff] }
  0x30   :  { %678 = vmatprep.subr.mxu1 %v121_v17  ;;  %644 = vmatpush3.msra.mxu0 %v73_v18  ;;  %v103_v27 = vld [vmem:[#allocation5 + $0x148] sm:$0xff]  ;;  %v102_v34 = vld [vmem:[#allocation5 + $0x140] sm:$0xff]  ;;  %v69_v37 = vld [vmem:[#allocation5 + $0x38] sm:$0xff] }
  0x31   :  { %679 = vmatpush3.msra.mxu1 %v105_v19  ;;  %645 = vmatprep.subr.mxu0 %v88_v20  ;;  %v101_v38 = vld [vmem:[#allocation5 + $0x138] sm:$0xff]  ;;  %v84_v39 = vld [vmem:[#allocation5 + $0xb0] sm:$0xff]  ;;  %v83_v45 = vld [vmem:[#allocation5 + $0xa8] sm:$0xff] }
  0x32   :  { %680 = vmatprep.subr.mxu1 %v120_v21  ;;  %646 = vmatpush3.msra.mxu0 %v72_v22  ;;  %v116_v40 = vld [vmem:[#allocation5 + $0x1b0] sm:$0xff]  ;;  %v115_v46 = vld [vmem:[#allocation5 + $0x1a8] sm:$0xff]  ;;  %v82_v49 = vld [vmem:[#allocation5 + $0xa0] sm:$0xff] }
  0x33   :  { %681 = vmatpush3.msra.mxu1 %v104_v23  ;;  %647 = vmatprep.subr.mxu0 %v87_v24  ;;  %v68_v43 = vld [vmem:[#allocation5 + $0x30] sm:$0xff]  ;;  %v67_v47 = vld [vmem:[#allocation5 + $0x28] sm:$0xff]  ;;  %v114_v50 = vld [vmem:[#allocation5 + $0x1a0] sm:$0xff] }
  0x34   :  { %682 = vmatprep.subr.mxu1 %v119_v25  ;;  %648 = vmatpush3.msra.mxu0 %v71_v26  ;;  %v100_v44 = vld [vmem:[#allocation5 + $0x130] sm:$0xff]  ;;  %v99_v48 = vld [vmem:[#allocation5 + $0x128] sm:$0xff]  ;;  %v66_v52 = vld [vmem:[#allocation5 + $0x20] sm:$0xff] }
  0x35   :  { %683 = vmatpush3.msra.mxu1 %v103_v27  ;;  %649 = vmatprep.subr.mxu0 %v86_v28  ;;  %v98_v53 = vld [vmem:[#allocation5 + $0x120] sm:$0xff]  ;;  %v60_v54 = vld [vmem:[#allocation2] sm:$0xff]  ;;  %v81_v55 = vld [vmem:[#allocation5 + $0x98] sm:$0xff] }
  0x36   :  { %684 = vmatprep.subr.mxu1 %v118_v29  ;;  %650 = vmatpush3.msra.mxu0 %v70_v33  ;;  %v113_v56 = vld [vmem:[#allocation5 + $0x198] sm:$0xff]  ;;  %v199_v57 = vcombine.high %v60_v54, %v60_v54  ;;  %v80_v60 = vld [vmem:[#allocation5 + $0x90] sm:$0xff]  ;;  %v206_v62 = vrot.slane %v60_v54, %v972_v51  ;;  %v79_v1 = vld [vmem:[#allocation5 + $0x88] sm:$0xff] }
  0x37   :  { %685 = vmatpush3.msra.mxu1 %v102_v34  ;;  %651 = vmatprep.subr.mxu0 %v85_v35  ;;  %v65_v58 = vld [vmem:[#allocation5 + $0x18] sm:$0xff]  ;;  %v112_v61 = vld [vmem:[#allocation5 + $0x190] sm:$0xff]  ;;  %v111_v2 = vld [vmem:[#allocation5 + $0x188] sm:$0xff] }
  0x38   :  { %686 = vmatprep.subr.mxu1 %v117_v36  ;;  %652 = vmatpush3.msra.mxu0 %v69_v37  ;;  %v97_v59 = vld [vmem:[#allocation5 + $0x118] sm:$0xff]  ;;  %v64_v63 = vld [vmem:[#allocation5 + $0x10] sm:$0xff]  ;;  %v213_v3 = vrot.slane %v199_v57, %v972_v51  ;;  %v63_v4 = vld [vmem:[#allocation5 + $0x8] sm:$0xff]  ;;  %v214_v8 = vcombine.high %v206_v62, %v206_v62 }
  0x39   :  { %687 = vmatpush3.msra.mxu1 %v101_v38  ;;  %653 = vmatprep.subr.mxu0 %v84_v39  ;;  %v96_v0 = vld [vmem:[#allocation5 + $0x110] sm:$0xff]  ;;  %v95_v5 = vld [vmem:[#allocation5 + $0x108] sm:$0xff]  ;;  %v78_v6 = vld [vmem:[#allocation5 + $0x80] sm:$0xff] }
  0x3a   :  { %688 = vmatprep.subr.mxu1 %v116_v40  ;;  %654 = vmatpush3.msra.mxu0 %v68_v43  ;;  %v110_v7 = vld [vmem:[#allocation5 + $0x180] sm:$0xff]  ;;  %v215_v11 = vcombine.high %v213_v3, %v213_v3  ;;  %v157_v12 = vld [vmem:[#allocation5 + $0x2f8] sm:$0xff]  ;;  %v156_v16 = vld [vmem:[#allocation5 + $0x2f0] sm:$0xff] }
  0x3b   :  { %689 = vmatpush3.msra.mxu1 %v100_v44  ;;  %655 = vmatprep.subr.mxu0 %v83_v45  ;;  %v62_v9 = vld [vmem:[#allocation5] sm:$0xff]  ;;  %v189_v13 = vld [vmem:[#allocation5 + $0x3f8] sm:$0xff]  ;;  %v188_v17 = vld [vmem:[#allocation5 + $0x3f0] sm:$0xff] }
  0x3c   :  { %690 = vmatprep.subr.mxu1 %v115_v46  ;;  %656 = vmatpush3.msra.mxu0 %v67_v47  ;;  %v94_v10 = vld [vmem:[#allocation5 + $0x100] sm:$0xff]  ;;  %v141_v14 = vld [vmem:[#allocation5 + $0x278] sm:$0xff]  ;;  %v140_v18 = vld [vmem:[#allocation5 + $0x270] sm:$0xff] }
  0x3d   :  { %691 = vmatpush3.msra.mxu1 %v99_v48  ;;  %657 = vmatprep.subr.mxu0 %v82_v49  ;;  %v173_v15 = vld [vmem:[#allocation5 + $0x378] sm:$0xff]  ;;  %v172_v19 = vld [vmem:[#allocation5 + $0x370] sm:$0xff]  ;;  %v155_v20 = vld [vmem:[#allocation5 + $0x2e8] sm:$0xff] }
  0x3e   :  { %692 = vmatprep.subr.mxu1 %v114_v50  ;;  %658 = vmatpush3.msra.mxu0 %v66_v52  ;;  %v187_v21 = vld [vmem:[#allocation5 + $0x3e8] sm:$0xff]  ;;  %v154_v24 = vld [vmem:[#allocation5 + $0x2e0] sm:$0xff]  ;;  %v153_v28 = vld [vmem:[#allocation5 + $0x2d8] sm:$0xff] }
  0x3f   :  { %693 = vmatpush3.msra.mxu1 %v98_v53  ;;  %659 = vmatprep.subr.mxu0 %v81_v55  ;;  %v139_v22 = vld [vmem:[#allocation5 + $0x268] sm:$0xff]  ;;  %v186_v25 = vld [vmem:[#allocation5 + $0x3e0] sm:$0xff]  ;;  %v185_v29 = vld [vmem:[#allocation5 + $0x3d8] sm:$0xff] }
  0x40   :  { %694 = vmatprep.subr.mxu1 %v113_v56  ;;  %660 = vmatpush3.msra.mxu0 %v65_v58  ;;  %v171_v23 = vld [vmem:[#allocation5 + $0x368] sm:$0xff]  ;;  %v138_v26 = vld [vmem:[#allocation5 + $0x260] sm:$0xff]  ;;  %v137_v30 = vld [vmem:[#allocation5 + $0x258] sm:$0xff] }
  0x41   :  { %695 = vmatpush3.msra.mxu1 %v97_v59  ;;  %661 = vmatprep.subr.mxu0 %v80_v60  ;;  %v170_v27 = vld [vmem:[#allocation5 + $0x360] sm:$0xff]  ;;  %v169_v31 = vld [vmem:[#allocation5 + $0x358] sm:$0xff]  ;;  %v152_v32 = vld [vmem:[#allocation5 + $0x2d0] sm:$0xff] }
  0x42   :  { %696 = vmatprep.subr.mxu1 %v112_v61  ;;  %662 = vmatpush3.msra.mxu0 %v64_v63  ;;  %v184_v33 = vld [vmem:[#allocation5 + $0x3d0] sm:$0xff]  ;;  %v151_v36 = vld [vmem:[#allocation5 + $0x2c8] sm:$0xff]  ;;  %v150_v40 = vld [vmem:[#allocation5 + $0x2c0] sm:$0xff] }
  0x43   :  { %697 = vmatpush3.msra.mxu1 %v96_v0  ;;  %663 = vmatprep.subr.mxu0 %v79_v1  ;;  %v136_v34 = vld [vmem:[#allocation5 + $0x250] sm:$0xff]  ;;  %v183_v37 = vld [vmem:[#allocation5 + $0x3c8] sm:$0xff]  ;;  %v182_v41 = vld [vmem:[#allocation5 + $0x3c0] sm:$0xff] }
  0x44   :  { %698 = vmatprep.subr.mxu1 %v111_v2  ;;  %664 = vmatpush3.msra.mxu0 %v63_v4  ;;  %v168_v35 = vld [vmem:[#allocation5 + $0x350] sm:$0xff]  ;;  %v135_v38 = vld [vmem:[#allocation5 + $0x248] sm:$0xff]  ;;  %v134_v42 = vld [vmem:[#allocation5 + $0x240] sm:$0xff] }
  0x45   :  { %699 = vmatpush3.msra.mxu1 %v95_v5  ;;  %665 = vmatprep.subr.mxu0 %v78_v6  ;;  %v167_v39 = vld [vmem:[#allocation5 + $0x348] sm:$0xff]  ;;  %v166_v43 = vld [vmem:[#allocation5 + $0x340] sm:$0xff]  ;;  %v149_v44 = vld [vmem:[#allocation5 + $0x2b8] sm:$0xff] }
  0x46   :  { %700 = vmatprep.subr.mxu1 %v110_v7  ;;  %666 = vmatpush3.msra.mxu0 %v62_v9  ;;  %v181_v45 = vld [vmem:[#allocation5 + $0x3b8] sm:$0xff]  ;;  %v148_v48 = vld [vmem:[#allocation5 + $0x2b0] sm:$0xff]  ;;  %v147_v53 = vld [vmem:[#allocation5 + $0x2a8] sm:$0xff] }
  0x47   :  { %305 = vmatprep.mubr.f32.mxu0 %v214_v8  ;;  %701 = vmatpush3.msra.mxu1 %v94_v10  ;;  %v133_v46 = vld [vmem:[#allocation5 + $0x238] sm:$0xff]  ;;  %v180_v49 = vld [vmem:[#allocation5 + $0x3b0] sm:$0xff]  ;;  %v179_v54 = vld [vmem:[#allocation5 + $0x3a8] sm:$0xff] }
  0x48   :  { %306 = vmatmul.mubr.f32.vlgmr.msra.gmra.mxu0 %v206_v62  ;;  %375 = vmatprep.mubr.f32.mxu1 %v215_v11  ;;  %v165_v47 = vld [vmem:[#allocation5 + $0x338] sm:$0xff]  ;;  %v132_v50 = vld [vmem:[#allocation5 + $0x230] sm:$0xff]  ;;  %v131_v56 = vld [vmem:[#allocation5 + $0x228] sm:$0xff] }
  0x49   :  { %705 = vmatprep.subr.mxu0 %v157_v12  ;;  %740 = vmatprep.subr.mxu1 %v189_v13  ;;  %v164_v52 = vld [vmem:[#allocation5 + $0x330] sm:$0xff]  ;;  %v61_v55 = vld [vmem:[#allocation2 + $0x8] sm:$0xff]  ;;  %v163_v57 = vld [vmem:[#allocation5 + $0x328] sm:$0xff] }
  0x4a   :  { %376 = vmatmul.mubr.f32.vlgmr.msra.gmra.mxu1 %v213_v3  ;;  %706 = vmatpush3.msra.mxu0 %v141_v14  ;;  %v146_v58 = vld [vmem:[#allocation5 + $0x2a0] sm:$0xff]  ;;  %v216_v62 = vcombine.high %v61_v55, %v61_v55  ;;  %v145_v63 = vld [vmem:[#allocation5 + $0x298] sm:$0xff]  ;;  %v144_v3 = vld [vmem:[#allocation5 + $0x290] sm:$0xff]  ;;  %v223_v5 = vrot.slane %v61_v55, %v972_v51 }
  0x4b   :  { %741 = vmatpush3.msra.mxu1 %v173_v15  ;;  %707 = vmatprep.subr.mxu0 %v156_v16  ;;  %v178_v59 = vld [vmem:[#allocation5 + $0x3a0] sm:$0xff]  ;;  %v177_v0 = vld [vmem:[#allocation5 + $0x398] sm:$0xff]  ;;  %v176_v4 = vld [vmem:[#allocation5 + $0x390] sm:$0xff] }
  0x4c   :  { %742 = vmatprep.subr.mxu1 %v188_v17  ;;  %708 = vmatpush3.msra.mxu0 %v140_v18  ;;  %v130_v60 = vld [vmem:[#allocation5 + $0x220] sm:$0xff]  ;;  %v129_v1 = vld [vmem:[#allocation5 + $0x218] sm:$0xff]  ;;  %v128_v6 = vld [vmem:[#allocation5 + $0x210] sm:$0xff]  ;;  %v230_v8 = vrot.slane %v216_v62, %v972_v51  ;;  %v231_v15 = vcombine.high %v223_v5, %v223_v5 }
  0x4d   :  { %743 = vmatpush3.msra.mxu1 %v172_v19  ;;  %709 = vmatprep.subr.mxu0 %v155_v20  ;;  %v162_v61 = vld [vmem:[#allocation5 + $0x320] sm:$0xff]  ;;  %v161_v2 = vld [vmem:[#allocation5 + $0x318] sm:$0xff]  ;;  %v160_v7 = vld [vmem:[#allocation5 + $0x310] sm:$0xff]  ;;  %v930_v19 = vmov 0.0  }
  0x4e   :  { %744 = vmatprep.subr.mxu1 %v187_v21  ;;  %710 = vmatpush3.msra.mxu0 %v139_v22  ;;  %v143_v9 = vld [vmem:[#allocation5 + $0x288] sm:$0xff]  ;;  %v142_v13 = vld [vmem:[#allocation5 + $0x280] sm:$0xff]  ;;  %v232_v17 = vcombine.high %v230_v8, %v230_v8  ;;  %v537_v18 = vld [vmem:[#allocation7 + $0x78] sm:$0xff] }
  0x4f   :  { %745 = vmatpush3.msra.mxu1 %v171_v23  ;;  %711 = vmatprep.subr.mxu0 %v154_v24  ;;  %v175_v10 = vld [vmem:[#allocation5 + $0x388] sm:$0xff]  ;;  %v174_v14 = vld [vmem:[#allocation5 + $0x380] sm:$0xff]  ;;  %v536_v20 = vld [vmem:[#allocation7 + $0x70] sm:$0xff] }
  0x50   :  { %746 = vmatprep.subr.mxu1 %v186_v25  ;;  %712 = vmatpush3.msra.mxu0 %v138_v26  ;;  %v127_v11 = vld [vmem:[#allocation5 + $0x208] sm:$0xff]  ;;  %v126_v16 = vld [vmem:[#allocation5 + $0x200] sm:$0xff]  ;;  %v533_v23 = vld [vmem:[#allocation7 + $0x58] sm:$0xff] }
  0x51   :  { %747 = vmatpush3.msra.mxu1 %v170_v27  ;;  %713 = vmatprep.subr.mxu0 %v153_v28  ;;  %v159_v12 = vld [vmem:[#allocation5 + $0x308] sm:$0xff]  ;;  %v158_v51 = vld [vmem:[#allocation5 + $0x300] sm:$0xff]  ;;  %v532_v24 = vld [vmem:[#allocation7 + $0x50] sm:$0xff] }
  0x52   :  { %748 = vmatprep.subr.mxu1 %v185_v29  ;;  %714 = vmatpush3.msra.mxu0 %v137_v30  ;;  %v535_v21 = vld [vmem:[#allocation7 + $0x68] sm:$0xff]  ;;  %v534_v22 = vld [vmem:[#allocation7 + $0x60] sm:$0xff]  ;;  %v529_v27 = vld [vmem:[#allocation7 + $0x38] sm:$0xff] }
  0x53   :  { %749 = vmatpush3.msra.mxu1 %v169_v31  ;;  %715 = vmatprep.subr.mxu0 %v152_v32  ;;  %v531_v25 = vld [vmem:[#allocation7 + $0x48] sm:$0xff]  ;;  %v530_v26 = vld [vmem:[#allocation7 + $0x40] sm:$0xff]  ;;  %v528_v28 = vld [vmem:[#allocation7 + $0x30] sm:$0xff] }
  0x54   :  { %750 = vmatprep.subr.mxu1 %v184_v33  ;;  %716 = vmatpush3.msra.mxu0 %v136_v34  ;;  %v527_v29 = vld [vmem:[#allocation7 + $0x28] sm:$0xff]  ;;  %v526_v30 = vld [vmem:[#allocation7 + $0x20] sm:$0xff]  ;;  %v525_v31 = vld [vmem:[#allocation7 + $0x18] sm:$0xff] }
  0x55   :  { %751 = vmatpush3.msra.mxu1 %v168_v35  ;;  %717 = vmatprep.subr.mxu0 %v151_v36  ;;  %v524_v32 = vld [vmem:[#allocation7 + $0x10] sm:$0xff]  ;;  %v523_v33 = vld [vmem:[#allocation7 + $0x8] sm:$0xff]  ;;  %v522_v34 = vld [vmem:[#allocation7] sm:$0xff] }
  0x56   :  { %752 = vmatprep.subr.mxu1 %v183_v37  ;;  %718 = vmatpush3.msra.mxu0 %v135_v38 }
  0x57   :  { %753 = vmatpush3.msra.mxu1 %v167_v39  ;;  %719 = vmatprep.subr.mxu0 %v150_v40  ;;  %v633_v39 = vld [vmem:[%s989_s2] ss:$0 sm:$0xff]  ;;  %s932_s2 = smov [#allocation8]  }
  0x58   :  { %754 = vmatprep.subr.mxu1 %v182_v41  ;;  %720 = vmatpush3.msra.mxu0 %v134_v42  ;;  %s623_s11 = sshll.u32 %s932_s2, 4  ;;  %s624_s11 = int_to_ptr.vmem [resolvable:$true] %s623_s11 }
  0x59   :  { %755 = vmatpush3.msra.mxu1 %v166_v43  ;;  %721 = vmatprep.subr.mxu0 %v149_v44  ;;  %s898_s12 = scalar_lea.vmem %s624_s11, 32  ;;  %p903_p2 = scmp.lt.s32.totalorder %s624_s11, %s624_s11 }
  0x5a   :  { %756 = vmatprep.subr.mxu1 %v181_v45  ;;  %722 = vmatpush3.msra.mxu0 %v133_v46  ;;  %p899_p1 = scmp.ne.s32.totalorder %s624_s11, %s898_s12  ;;  %p904_p3 = scmp.lt.s32.totalorder %s898_s12, %s898_s12 }
  0x5b   :  { %757 = vmatpush3.msra.mxu1 %v165_v47  ;;  %723 = vmatprep.subr.mxu0 %v148_v48 }
  0x5c   :  { %758 = vmatprep.subr.mxu1 %v180_v49  ;;  %724 = vmatpush3.msra.mxu0 %v132_v50  ;;  %p905_p4 = por %p904_p3, %p903_p2 }
  0x5d   :  { %759 = vmatpush3.msra.mxu1 %v164_v52  ;;  %725 = vmatprep.subr.mxu0 %v147_v53 }
  0x5e   :  { %760 = vmatprep.subr.mxu1 %v179_v54  ;;  %726 = vmatpush3.msra.mxu0 %v131_v56  ;;  %v634_v54 = vld [vmem:[%s991_s4] ss:$0 sm:$0xff]  ;;  %p906_p5 = pnand %p905_p4, %p899_p1 }
  0x5f   :  { %761 = vmatpush3.msra.mxu1 %v163_v57  ;;  %727 = vmatprep.subr.mxu0 %v146_v58 }
  0x60   :  { %762 = vmatprep.subr.mxu1 %v178_v59  ;;  %728 = vmatpush3.msra.mxu0 %v130_v60 }
  0x61   :  { %763 = vmatpush3.msra.mxu1 %v162_v61  ;;  %729 = vmatprep.subr.mxu0 %v145_v63 }
  0x62   :  { %764 = vmatprep.subr.mxu1 %v177_v0  ;;  %730 = vmatpush3.msra.mxu0 %v129_v1 }
  0x63   :  { %765 = vmatpush3.msra.mxu1 %v161_v2  ;;  %731 = vmatprep.subr.mxu0 %v144_v3 }
  0x64   :  { %766 = vmatprep.subr.mxu1 %v176_v4  ;;  %732 = vmatpush3.msra.mxu0 %v128_v6 }
  0x65   :  { %767 = vmatpush3.msra.mxu1 %v160_v7  ;;  %733 = vmatprep.subr.mxu0 %v143_v9 }
  0x66   :  { %768 = vmatprep.subr.mxu1 %v175_v10  ;;  %734 = vmatpush3.msra.mxu0 %v127_v11 }
  0x67   :  { %769 = vmatpush3.msra.mxu1 %v159_v12  ;;  %735 = vmatprep.subr.mxu0 %v142_v13 }
  0x68   :  { %770 = vmatprep.subr.mxu1 %v174_v14  ;;  %736 = vmatpush3.msra.mxu0 %v126_v16 }
  0x69   :  { %445 = vmatprep.mubr.f32.mxu0 %v231_v15  ;;  %771 = vmatpush3.msra.mxu1 %v158_v51 }
  0x6a   :  { %515 = vmatprep.mubr.f32.mxu1 %v232_v17  ;;  %446 = vmatmul.mubr.f32.vlgmr.msra.gmra.mxu0 %v223_v5 }
  0x6b   :  { %516 = vmatmul.mubr.f32.vlgmr.msra.gmra.mxu1 %v230_v8  ;;  %792 = vmatprep.subr.mxu0 %v930_v19 }
  0x6c   :  { %793 = vmatpush3.msra.mxu0 %v537_v18  ;;  %824 = vmatprep.mubr.msk.f32.mxu0 %vm931_vm0, %v930_v19 }
  0x6d   :  { %794 = vmatprep.subr.mxu0 %v930_v19 }
  0x6e   :  { %795 = vmatpush3.msra.mxu0 %v536_v20 }
  0x6f   :  { %796 = vmatprep.subr.mxu0 %v930_v19 }
  0x70   :  { %797 = vmatpush3.msra.mxu0 %v535_v21 }
  0x71   :  { %798 = vmatprep.subr.mxu0 %v930_v19 }
  0x72   :  { %799 = vmatpush3.msra.mxu0 %v534_v22 }
  0x73   :  { %800 = vmatprep.subr.mxu0 %v930_v19 }
  0x74   :  { %801 = vmatpush3.msra.mxu0 %v533_v23 }
  0x75   :  { %802 = vmatprep.subr.mxu0 %v930_v19 }
  0x76   :  { %803 = vmatpush3.msra.mxu0 %v532_v24 }
  0x77   :  { %804 = vmatprep.subr.mxu0 %v930_v19 }
  0x78   :  { %805 = vmatpush3.msra.mxu0 %v531_v25 }
  0x79   :  { %806 = vmatprep.subr.mxu0 %v930_v19 }
  0x7a   :  { %807 = vmatpush3.msra.mxu0 %v530_v26 }
  0x7b   :  { %808 = vmatprep.subr.mxu0 %v930_v19 }
  0x7c   :  { %809 = vmatpush3.msra.mxu0 %v529_v27 }
  0x7d   :  { %810 = vmatprep.subr.mxu0 %v930_v19 }
  0x7e   :  { %811 = vmatpush3.msra.mxu0 %v528_v28 }
  0x7f   :  { %812 = vmatprep.subr.mxu0 %v930_v19 }
  0x80   :  { %813 = vmatpush3.msra.mxu0 %v527_v29 }
  0x81   :  { %814 = vmatprep.subr.mxu0 %v930_v19 }
  0x82   :  { %815 = vmatpush3.msra.mxu0 %v526_v30 }
  0x83   :  { %816 = vmatprep.subr.mxu0 %v930_v19 }
  0x84   :  { %817 = vmatpush3.msra.mxu0 %v525_v31 }
  0x85   :  { %818 = vmatprep.subr.mxu0 %v930_v19 }
  0x86   :  { %819 = vmatpush3.msra.mxu0 %v524_v32 }
  0x87   :  { %820 = vmatprep.subr.mxu0 %v930_v19 }
  0x88   :  { %821 = vmatpush3.msra.mxu0 %v523_v33 }
  0x89   :  { %822 = vmatprep.subr.mxu0 %v930_v19 }
  0x8a   :  { %823 = vmatpush3.msra.mxu0 %v522_v34 }
 0x108   :  { %v667_v35 = vpop.f32.mrf.mxu0 }
 0x10a   :  { %v702_v36 = vpop.f32.mrf.mxu1  ;;  %v668_v37 = vpop.f32.mrf.mxu0 }
 0x10b   :  { %v669_v38 = vadd.f32 %v668_v37, %v667_v35 }
 0x10c   :  { %v703_v40 = vpop.f32.mrf.mxu1 }
 0x10d   :  { %v308_v41 = vadd.f32 %v669_v38, %v633_v39  ;;  %v704_v42 = vadd.f32 %v703_v40, %v702_v36 }
 0x10f   :  { %v378_v47 = vadd.f32 %v704_v42, %v308_v41 }
 0x12a   :  { %v737_v43 = vpop.f32.mrf.mxu0 }
 0x12b   :  { %v772_v44 = vpop.f32.mrf.mxu1 }
 0x12c   :  { %v738_v45 = vpop.f32.mrf.mxu0 }
 0x12d   :  { %v773_v46 = vpop.f32.mrf.mxu1  ;;  %v739_v48 = vadd.f32 %v738_v45, %v737_v43 }
 0x12e   :  { %v774_v50 = vadd.f32 %v773_v46, %v772_v44 }
 0x12f   :  { %v448_v49 = vadd.f32 %v739_v48, %v378_v47 }
 0x131   :  { %v518_v52 = vadd.f32 %v774_v50, %v448_v49 }
 0x133   :  { %v521_v53 = vmax.f32 %v518_v52, 0.0 }
 0x135   :  { %825 = vmatmul.mubr.f32.vlgmr.msra.gmra.mxu0 %v521_v53 }
 0x1f5   :  { %v611_v55 = vpop.f32.mrf.mxu0 }
 0x1f6   :  { %v612_v56 = vadd.f32 %v634_v54, %v611_v55 }
 0x1f7   :  { %v826_v57 = vpop.f32.mrf.mxu0 }
 0x1f8   :  { %v615_v58 = vmax.f32 %v612_v56, 0.0 }
 0x1fa   :  { %616 = vst [vmem:[#allocation8] sm:$0x3] %v615_v58 }
 0x1fb   :  { %909 = shalt.err (!%p906_p5)
}
 0x1fc   :  { %626 = dma.vmem_to_hbm [thread:$0]  %s624_s11, 32, %s992_s5, [#allocation4]  }
 0x1fd   :  { %922 = dma.done.wait [#allocation4], 32  }
 0x1fe   :  { %923 = vsyncadd [#allocation4], 4294967264 }
 0x1ff   :  { %630 = vsyncpa [#allocation3], 1 }
 0x200   :  { %631 = vsyncpa [#allocation6], 1 }
 0x201   :  { %632 = vsyncpa [#allocation4], 1 }

</bundles_post_ra>
